<compile_context>
chip_gen: v5e
topology: v5e:2x2
jax: 0.10.0
libtpu: 0.0.40
codegen_flags: <defaults>
</compile_context>

<pallas_src>
import jax
import jax.numpy as jnp
from jax.experimental import pallas as pl
from jax.experimental.pallas import tpu as pltpu


def _pick_channel_tile(cout):
    """Whole Cout as one tile when small, else a multiple-of-8 divisor (keeps
    the (TC, L) output block a legal sublane/lane tile and bounds live slabs)."""
    if cout <= 32:
        return cout
    for d in range(32, 7, -1):
        if cout % d == 0 and d % 8 == 0:
            return d
    return cout


def _pick_row_strip(h, w, tc):
    """Rows per strip: TH | H, TH*W a multiple of 128 (lane-dense blocks), and
    the (TC, TH*W) slab kept around a few hundred KiB."""
    l_max = max(128, (256 * 1024) // (4 * tc))
    if h * w <= l_max:
        return h
    cands = [t for t in range(1, h) if h % t == 0 and (t * w) % 128 == 0]
    fit = [t for t in cands if t * w <= l_max]
    if fit:
        return max(fit)
    if cands:
        return min(cands)          # smallest legal strip; over budget -> spills
    # TODO(synk): W has no 128-aligned strip; fall back to the full plane.
    return h


def _make_bsconvu_kernel(tc, cin, w, l, l_pad):
    def kernel(x_ref, pw_ref, dw_ref, b_ref, o_ref):
        # x_ref : (1, 1, Cin, L_pad) VMEM  row-padded flattened strip ((TH+2)*W)
        # pw_ref: (1, TC, Cin)       VMEM  pointwise weights
        # dw_ref: (1, TC, 9)         VMEM  depthwise 3x3 weights (kh-major)
        # b_ref : (1, TC, 1)         VMEM  depthwise bias
        # o_ref : (1, TC, L)         VMEM  output strip, L = TH*W lanes
        x_all = x_ref[0, 0]                       # (Cin, L_pad)
        pw = pw_ref[0]                            # (TC, Cin)

        # ---- 1x1 pointwise conv on the whole channel tile -------------------
        if cin >= 32:
            # Large contraction: one MXU matmul computes all TC channels.
            ypad = jnp.dot(pw, x_all, preferred_element_type=jnp.float32)
        else:
            # Tiny Cin: VPU broadcast-MACs ((TC,1) x (1,L_pad)).
            ypad = pw[:, 0:1] * x_all[0:1, :]
            for ci in range(1, cin):
                ypad = ypad + pw[:, ci:ci + 1] * x_all[ci:ci + 1, :]
        ypad = ypad.astype(jnp.float32)           # (TC, L_pad)

        # ---- lane masks for the reflected left / right image columns --------
        col = jax.lax.broadcasted_iota(jnp.int32, (1, l), 1) % w
        left = col == 0
        right = col == (w - 1)

        def shifted(k):
            # out[:, p] = ypad[:, p + k].  The (at most one) lane where p + k
            # falls outside [0, L_pad) is only ever consumed under a mask.
            if k < 0:
                return jnp.concatenate([ypad[:, :1], ypad[:, :l + k]], axis=1)
            if k + l > l_pad:
                return jnp.concatenate([ypad[:, k:], ypad[:, :k + l - l_pad]],
                                       axis=1)
            return ypad[:, k:k + l]

        # ---- 3x3 depthwise conv + bias (bias folded into the first tap) -----
        dw = dw_ref[0]                            # (TC, 9)
        acc = b_ref[0] + shifted(w) * dw[:, 4:5]  # center tap (kh=1, kw=1)
        for kh in range(3):
            base = kh * w
            sm1 = shifted(base - 1)               # column w-1 (interior)
            sp1 = shifted(base + 1)               # column w+1 (interior)
            t0 = jnp.where(left, sp1, sm1)        # kw=0, reflect at w == 0
            t2 = jnp.where(right, sm1, sp1)       # kw=2, reflect at w == W-1
            acc = acc + t0 * dw[:, 3 * kh + 0:3 * kh + 1]
            acc = acc + t2 * dw[:, 3 * kh + 2:3 * kh + 3]
            if kh != 1:                           # kh==1, kw==1 already done
                acc = acc + shifted(base) * dw[:, 3 * kh + 1:3 * kh + 2]

        o_ref[0] = acc.astype(o_ref.dtype)        # one lane-dense slab store

    return kernel


def bsconvu(x_nchw, pw_w, dw_w, dw_b):
    """x: (N,Cin,H,W); pw_w: (Cout,Cin,1,1); dw_w: (Cout,1,3,3); dw_b: (Cout,)."""
    N, Cin, H, W = x_nchw.shape
    Cout = pw_w.shape[0]
    assert H >= 2 and W >= 2, "reflect padding needs H, W >= 2 (same as PyTorch)"

    TC = _pick_channel_tile(Cout)
    n_ct = Cout // TC
    TH = _pick_row_strip(H, W, TC)
    n_s = H // TH
    L = TH * W
    L_pad = (TH + 2) * W

    # Reflect-pad x along H once (commutes with the 1x1 conv) and gather
    # overlapping (TH+2)-row strips: each grid step gets its 1-row halo with no
    # in-kernel row fixups and no manual halo DMA.
    xp = jnp.pad(x_nchw, ((0, 0), (0, 0), (1, 1), (0, 0)), mode="reflect")
    if n_s == 1:
        xs = xp.reshape(N, 1, Cin, L_pad)
    else:
        xs = jnp.stack(
            [xp[:, :, s * TH:s * TH + TH + 2, :] for s in range(n_s)], axis=1
        ).reshape(N, n_s, Cin, L_pad)

    # Per-output-channel weights as (TC, k) columns in VMEM (no SMEM padding).
    pw = pw_w.reshape(Cout, Cin).astype(jnp.float32).reshape(n_ct, TC, Cin)
    dwk = dw_w.reshape(Cout, 9).astype(jnp.float32).reshape(n_ct, TC, 9)
    bias = dw_b.reshape(Cout).astype(jnp.float32).reshape(n_ct, TC, 1)

    # Double-buffered in/out blocks + tiny weight blocks, with headroom for
    # in-kernel temporaries/spills; capped at 48 MiB to leave v7x slack.
    blk_bytes = 4 * (Cin * L_pad + TC * L + TC * (Cin + 9 + 1))
    vmem_limit = int(min(48 * 1024 * 1024, max(32 * 1024 * 1024, 4 * blk_bytes)))

    # The channel-tile axis reuses the same x block: keep it off the megacore
    # split whenever batch/strips can be split instead (no duplicate x DMA).
    ct_sem = "parallel" if (N * n_s) == 1 else "arbitrary"

    kernel = _make_bsconvu_kernel(TC, Cin, W, L, L_pad)

    out_flat = pl.pallas_call(
        kernel,
        out_shape=jax.ShapeDtypeStruct((N, Cout, H * W), x_nchw.dtype),
        grid=(N, n_s, n_ct),
        in_specs=[
            # x strip: block index constant along the innermost (channel-tile)
            # axis -> DMA'd once per (n, strip).
            # TODO(synk): pipeline_mode=pl.Buffered(1) here would halve its VMEM
            # footprint on v7x; left double-buffered for portability.
            pl.BlockSpec((1, 1, Cin, L_pad), lambda n, s, ct: (n, s, 0, 0)),
            pl.BlockSpec((1, TC, Cin), lambda n, s, ct: (ct, 0, 0)),
            pl.BlockSpec((1, TC, 9), lambda n, s, ct: (ct, 0, 0)),
            pl.BlockSpec((1, TC, 1), lambda n, s, ct: (ct, 0, 0)),
        ],
        out_specs=pl.BlockSpec((1, TC, L), lambda n, s, ct: (n, ct, s)),
        compiler_params=pltpu.CompilerParams(
            dimension_semantics=("parallel", "parallel", ct_sem),
            vmem_limit_bytes=vmem_limit,
        ),
    )(xs, pw, dwk, bias)

    # Free (contiguous) reshape back to NCHW.
    return out_flat.reshape(N, Cout, H, W)


def bsconvu_reference(x_nchw, pw_w, dw_w, dw_b):
    """Pure-JAX reference mirroring PyTorch semantics (for verification)."""
    y = jnp.einsum('nchw,oc->nohw', x_nchw, pw_w[:, :, 0, 0],
                   precision=jax.lax.Precision.HIGHEST)
    yp = jnp.pad(y, ((0, 0), (0, 0), (1, 1), (1, 1)), mode='reflect')
    N, Cout, H, W = y.shape
    out = jnp.zeros_like(y)
    for kh in range(3):
        for kw in range(3):
            out = out + yp[:, :, kh:kh + H, kw:kw + W] * \
                dw_w[:, 0, kh, kw][None, :, None, None]
    return out + dw_b[None, :, None, None]


if __name__ == "__main__":
    key = jax.random.PRNGKey(0)
    k_x, k_pw, k_dw, k_b = jax.random.split(key, 4)

    N, Cin, Cout, H, W = 2, 4, 8, 16, 16

    x = jax.random.normal(k_x, (N, Cin, H, W), dtype=jnp.float32)
    pw_w = jax.random.normal(k_pw, (Cout, Cin, 1, 1), dtype=jnp.float32) * 0.1
    dw_w = jax.random.normal(k_dw, (Cout, 1, 3, 3), dtype=jnp.float32) * 0.1
    dw_b = jax.random.normal(k_b, (Cout,), dtype=jnp.float32) * 0.1

    out = jax.block_until_ready(bsconvu(x, pw_w, dw_w, dw_b))

    ref = bsconvu_reference(x, pw_w, dw_w, dw_b)
    assert out.shape == (N, Cout, H, W)
    assert jnp.allclose(out, ref, atol=1e-5, rtol=1e-5), "mismatch vs reference"

    print("KERNEL_OK")
</pallas_src>

<mosaic_0001>
module attributes {stable_mosaic.version = 11 : i64} {
  func.func @kernel(%arg0: i32, %arg1: i32, %arg2: i32, %arg3: memref<1x1x4x288xf32, #tpu.memory_space<vmem>>, %arg4: memref<1x8x4xf32, #tpu.memory_space<vmem>>, %arg5: memref<1x8x9xf32, #tpu.memory_space<vmem>>, %arg6: memref<1x8x1xf32, #tpu.memory_space<vmem>>, %arg7: memref<1x8x256xf32, #tpu.memory_space<vmem>>) attributes {dimension_semantics = [#tpu.dimension_semantics<parallel>, #tpu.dimension_semantics<parallel>, #tpu.dimension_semantics<arbitrary>], iteration_bounds = array<i64: 2, 1, 1>, scalar_prefetch = 0 : i64, scratch_operands = 0 : i64, tpu.core_type = #tpu.core_type<tc>, window_params = [{transform_indices = @transform_0, window_bounds = array<i64: 1, 1, 4, 288>}, {transform_indices = @transform_1, window_bounds = array<i64: 1, 8, 4>}, {transform_indices = @transform_2, window_bounds = array<i64: 1, 8, 9>}, {transform_indices = @transform_3, window_bounds = array<i64: 1, 8, 1>}, {transform_indices = @transform_4, window_bounds = array<i64: 1, 8, 256>}]} {
    %c0 = arith.constant 0 : index
    %c0_0 = arith.constant 0 : index
    %c0_1 = arith.constant 0 : index
    %c0_2 = arith.constant 0 : index
    %0 = vector.load %arg3[%c0, %c0_0, %c0_1, %c0_2] : memref<1x1x4x288xf32, #tpu.memory_space<vmem>>, vector<1x1x4x288xf32>
    %1 = vector.shape_cast %0 : vector<1x1x4x288xf32> to vector<4x288xf32>
    %c0_3 = arith.constant 0 : index
    %c0_4 = arith.constant 0 : index
    %c0_5 = arith.constant 0 : index
    %2 = vector.load %arg4[%c0_3, %c0_4, %c0_5] : memref<1x8x4xf32, #tpu.memory_space<vmem>>, vector<1x8x4xf32>
    %3 = vector.shape_cast %2 : vector<1x8x4xf32> to vector<8x4xf32>
    %4 = vector.extract_strided_slice %3 {offsets = [0, 0], sizes = [8, 1], strides = [1, 1]} : vector<8x4xf32> to vector<8x1xf32>
    %5 = vector.extract_strided_slice %1 {offsets = [0, 0], sizes = [1, 288], strides = [1, 1]} : vector<4x288xf32> to vector<1x288xf32>
    %6 = vector.broadcast %4 : vector<8x1xf32> to vector<8x288xf32>
    %7 = vector.broadcast %5 : vector<1x288xf32> to vector<8x288xf32>
    %8 = arith.mulf %6, %7 : vector<8x288xf32>
    %9 = vector.extract_strided_slice %3 {offsets = [0, 1], sizes = [8, 1], strides = [1, 1]} : vector<8x4xf32> to vector<8x1xf32>
    %10 = vector.extract_strided_slice %1 {offsets = [1, 0], sizes = [1, 288], strides = [1, 1]} : vector<4x288xf32> to vector<1x288xf32>
    %11 = vector.broadcast %9 : vector<8x1xf32> to vector<8x288xf32>
    %12 = vector.broadcast %10 : vector<1x288xf32> to vector<8x288xf32>
    %13 = arith.mulf %11, %12 : vector<8x288xf32>
    %14 = arith.addf %8, %13 : vector<8x288xf32>
    %15 = vector.extract_strided_slice %3 {offsets = [0, 2], sizes = [8, 1], strides = [1, 1]} : vector<8x4xf32> to vector<8x1xf32>
    %16 = vector.extract_strided_slice %1 {offsets = [2, 0], sizes = [1, 288], strides = [1, 1]} : vector<4x288xf32> to vector<1x288xf32>
    %17 = vector.broadcast %15 : vector<8x1xf32> to vector<8x288xf32>
    %18 = vector.broadcast %16 : vector<1x288xf32> to vector<8x288xf32>
    %19 = arith.mulf %17, %18 : vector<8x288xf32>
    %20 = arith.addf %14, %19 : vector<8x288xf32>
    %21 = vector.extract_strided_slice %3 {offsets = [0, 3], sizes = [8, 1], strides = [1, 1]} : vector<8x4xf32> to vector<8x1xf32>
    %22 = vector.extract_strided_slice %1 {offsets = [3, 0], sizes = [1, 288], strides = [1, 1]} : vector<4x288xf32> to vector<1x288xf32>
    %23 = vector.broadcast %21 : vector<8x1xf32> to vector<8x288xf32>
    %24 = vector.broadcast %22 : vector<1x288xf32> to vector<8x288xf32>
    %25 = arith.mulf %23, %24 : vector<8x288xf32>
    %26 = arith.addf %20, %25 : vector<8x288xf32>
    %27 = tpu.iota {dimensions = array<i32: 1>} : vector<1x256xi32>
    %c16_i32 = arith.constant 16 : i32
    %c0_i32 = arith.constant 0 : i32
    %28 = arith.cmpi eq, %c16_i32, %c0_i32 : i32
    %c1_i32 = arith.constant 1 : i32
    %29 = arith.select %28, %c1_i32, %c16_i32 : i32
    %30 = vector.broadcast %29 : i32 to vector<1x256xi32>
    %31 = arith.remsi %27, %30 : vector<1x256xi32>
    %c0_i32_6 = arith.constant 0 : i32
    %32 = vector.broadcast %c0_i32_6 : i32 to vector<1x256xi32>
    %33 = arith.cmpi ne, %31, %32 : vector<1x256xi32>
    %c0_i32_7 = arith.constant 0 : i32
    %34 = vector.broadcast %c0_i32_7 : i32 to vector<1x256xi32>
    %35 = arith.cmpi slt, %31, %34 : vector<1x256xi32>
    %c0_i32_8 = arith.constant 0 : i32
    %36 = arith.cmpi slt, %29, %c0_i32_8 : i32
    %37 = vector.broadcast %36 : i1 to vector<1x256xi1>
    %38 = vector.broadcast %37 : vector<1x256xi1> to vector<1x256xi1>
    %39 = arith.xori %35, %38 : vector<1x256xi1>
    %40 = arith.andi %39, %33 : vector<1x256xi1>
    %41 = vector.broadcast %29 : i32 to vector<1x256xi32>
    %42 = arith.addi %31, %41 : vector<1x256xi32>
    %43 = arith.select %40, %42, %31 : vector<1x256xi1>, vector<1x256xi32>
    %c0_i32_9 = arith.constant 0 : i32
    %44 = vector.broadcast %c0_i32_9 : i32 to vector<1x256xi32>
    %45 = arith.cmpi eq, %43, %44 : vector<1x256xi32>
    %c15_i32 = arith.constant 15 : i32
    %46 = vector.broadcast %c15_i32 : i32 to vector<1x256xi32>
    %47 = arith.cmpi eq, %43, %46 : vector<1x256xi32>
    %c0_10 = arith.constant 0 : index
    %c0_11 = arith.constant 0 : index
    %c0_12 = arith.constant 0 : index
    %48 = vector.load %arg5[%c0_10, %c0_11, %c0_12] : memref<1x8x9xf32, #tpu.memory_space<vmem>>, vector<1x8x9xf32>
    %49 = vector.shape_cast %48 : vector<1x8x9xf32> to vector<8x9xf32>
    %c0_13 = arith.constant 0 : index
    %c0_14 = arith.constant 0 : index
    %c0_15 = arith.constant 0 : index
    %50 = vector.load %arg6[%c0_13, %c0_14, %c0_15] : memref<1x8x1xf32, #tpu.memory_space<vmem>>, vector<1x8x1xf32>
    %51 = vector.shape_cast %50 : vector<1x8x1xf32> to vector<8x1xf32>
    %52 = vector.extract_strided_slice %26 {offsets = [0, 16], sizes = [8, 256], strides = [1, 1]} : vector<8x288xf32> to vector<8x256xf32>
    %53 = vector.extract_strided_slice %49 {offsets = [0, 4], sizes = [8, 1], strides = [1, 1]} : vector<8x9xf32> to vector<8x1xf32>
    %54 = vector.broadcast %53 : vector<8x1xf32> to vector<8x256xf32>
    %55 = arith.mulf %52, %54 : vector<8x256xf32>
    %56 = vector.broadcast %51 : vector<8x1xf32> to vector<8x256xf32>
    %57 = arith.addf %56, %55 : vector<8x256xf32>
    %58 = vector.extract_strided_slice %26 {offsets = [0, 0], sizes = [8, 1], strides = [1, 1]} : vector<8x288xf32> to vector<8x1xf32>
    %59 = vector.extract_strided_slice %26 {offsets = [0, 0], sizes = [8, 255], strides = [1, 1]} : vector<8x288xf32> to vector<8x255xf32>
    %60 = tpu.concatenate %58, %59 in 1 : vector<8x1xf32>, vector<8x255xf32> -> vector<8x256xf32>
    %61 = vector.extract_strided_slice %26 {offsets = [0, 1], sizes = [8, 256], strides = [1, 1]} : vector<8x288xf32> to vector<8x256xf32>
    %62 = vector.shape_cast %45 : vector<1x256xi1> to vector<1x256xi1>
    %63 = vector.broadcast %62 : vector<1x256xi1> to vector<8x256xi1>
    %64 = arith.select %63, %61, %60 : vector<8x256xi1>, vector<8x256xf32>
    %65 = vector.shape_cast %47 : vector<1x256xi1> to vector<1x256xi1>
    %66 = vector.broadcast %65 : vector<1x256xi1> to vector<8x256xi1>
    %67 = arith.select %66, %60, %61 : vector<8x256xi1>, vector<8x256xf32>
    %68 = vector.extract_strided_slice %49 {offsets = [0, 0], sizes = [8, 1], strides = [1, 1]} : vector<8x9xf32> to vector<8x1xf32>
    %69 = vector.broadcast %68 : vector<8x1xf32> to vector<8x256xf32>
    %70 = arith.mulf %64, %69 : vector<8x256xf32>
    %71 = arith.addf %57, %70 : vector<8x256xf32>
    %72 = vector.extract_strided_slice %49 {offsets = [0, 2], sizes = [8, 1], strides = [1, 1]} : vector<8x9xf32> to vector<8x1xf32>
    %73 = vector.broadcast %72 : vector<8x1xf32> to vector<8x256xf32>
    %74 = arith.mulf %67, %73 : vector<8x256xf32>
    %75 = arith.addf %71, %74 : vector<8x256xf32>
    %76 = vector.extract_strided_slice %26 {offsets = [0, 0], sizes = [8, 256], strides = [1, 1]} : vector<8x288xf32> to vector<8x256xf32>
    %77 = vector.extract_strided_slice %49 {offsets = [0, 1], sizes = [8, 1], strides = [1, 1]} : vector<8x9xf32> to vector<8x1xf32>
    %78 = vector.broadcast %77 : vector<8x1xf32> to vector<8x256xf32>
    %79 = arith.mulf %76, %78 : vector<8x256xf32>
    %80 = arith.addf %75, %79 : vector<8x256xf32>
    %81 = vector.extract_strided_slice %26 {offsets = [0, 15], sizes = [8, 256], strides = [1, 1]} : vector<8x288xf32> to vector<8x256xf32>
    %82 = vector.extract_strided_slice %26 {offsets = [0, 17], sizes = [8, 256], strides = [1, 1]} : vector<8x288xf32> to vector<8x256xf32>
    %83 = vector.shape_cast %45 : vector<1x256xi1> to vector<1x256xi1>
    %84 = vector.broadcast %83 : vector<1x256xi1> to vector<8x256xi1>
    %85 = arith.select %84, %82, %81 : vector<8x256xi1>, vector<8x256xf32>
    %86 = vector.shape_cast %47 : vector<1x256xi1> to vector<1x256xi1>
    %87 = vector.broadcast %86 : vector<1x256xi1> to vector<8x256xi1>
    %88 = arith.select %87, %81, %82 : vector<8x256xi1>, vector<8x256xf32>
    %89 = vector.extract_strided_slice %49 {offsets = [0, 3], sizes = [8, 1], strides = [1, 1]} : vector<8x9xf32> to vector<8x1xf32>
    %90 = vector.broadcast %89 : vector<8x1xf32> to vector<8x256xf32>
    %91 = arith.mulf %85, %90 : vector<8x256xf32>
    %92 = arith.addf %80, %91 : vector<8x256xf32>
    %93 = vector.extract_strided_slice %49 {offsets = [0, 5], sizes = [8, 1], strides = [1, 1]} : vector<8x9xf32> to vector<8x1xf32>
    %94 = vector.broadcast %93 : vector<8x1xf32> to vector<8x256xf32>
    %95 = arith.mulf %88, %94 : vector<8x256xf32>
    %96 = arith.addf %92, %95 : vector<8x256xf32>
    %97 = vector.extract_strided_slice %26 {offsets = [0, 31], sizes = [8, 256], strides = [1, 1]} : vector<8x288xf32> to vector<8x256xf32>
    %98 = vector.extract_strided_slice %26 {offsets = [0, 33], sizes = [8, 255], strides = [1, 1]} : vector<8x288xf32> to vector<8x255xf32>
    %99 = vector.extract_strided_slice %26 {offsets = [0, 0], sizes = [8, 1], strides = [1, 1]} : vector<8x288xf32> to vector<8x1xf32>
    %100 = tpu.concatenate %98, %99 in 1 : vector<8x255xf32>, vector<8x1xf32> -> vector<8x256xf32>
    %101 = vector.shape_cast %45 : vector<1x256xi1> to vector<1x256xi1>
    %102 = vector.broadcast %101 : vector<1x256xi1> to vector<8x256xi1>
    %103 = arith.select %102, %100, %97 : vector<8x256xi1>, vector<8x256xf32>
    %104 = vector.shape_cast %47 : vector<1x256xi1> to vector<1x256xi1>
    %105 = vector.broadcast %104 : vector<1x256xi1> to vector<8x256xi1>
    %106 = arith.select %105, %97, %100 : vector<8x256xi1>, vector<8x256xf32>
    %107 = vector.extract_strided_slice %49 {offsets = [0, 6], sizes = [8, 1], strides = [1, 1]} : vector<8x9xf32> to vector<8x1xf32>
    %108 = vector.broadcast %107 : vector<8x1xf32> to vector<8x256xf32>
    %109 = arith.mulf %103, %108 : vector<8x256xf32>
    %110 = arith.addf %96, %109 : vector<8x256xf32>
    %111 = vector.extract_strided_slice %49 {offsets = [0, 8], sizes = [8, 1], strides = [1, 1]} : vector<8x9xf32> to vector<8x1xf32>
    %112 = vector.broadcast %111 : vector<8x1xf32> to vector<8x256xf32>
    %113 = arith.mulf %106, %112 : vector<8x256xf32>
    %114 = arith.addf %110, %113 : vector<8x256xf32>
    %115 = vector.extract_strided_slice %26 {offsets = [0, 32], sizes = [8, 256], strides = [1, 1]} : vector<8x288xf32> to vector<8x256xf32>
    %116 = vector.extract_strided_slice %49 {offsets = [0, 7], sizes = [8, 1], strides = [1, 1]} : vector<8x9xf32> to vector<8x1xf32>
    %117 = vector.broadcast %116 : vector<8x1xf32> to vector<8x256xf32>
    %118 = arith.mulf %115, %117 : vector<8x256xf32>
    %119 = arith.addf %114, %118 : vector<8x256xf32>
    %c0_16 = arith.constant 0 : index
    %c0_17 = arith.constant 0 : index
    %c0_18 = arith.constant 0 : index
    %120 = vector.load %arg7[%c0_16, %c0_17, %c0_18] : memref<1x8x256xf32, #tpu.memory_space<vmem>>, vector<1x8x256xf32>
    %121 = vector.shape_cast %120 : vector<1x8x256xf32> to vector<8x256xf32>
    %122 = vector.shape_cast %119 : vector<8x256xf32> to vector<1x8x256xf32>
    tpu.vector_store %arg7[%c0_16, %c0_17, %c0_18], %122 {strides = array<i32>} : memref<1x8x256xf32, #tpu.memory_space<vmem>>, vector<1x8x256xf32>,
    return
  }
  func.func @transform_0(%arg0: i32, %arg1: i32, %arg2: i32) -> (i32, i32, i32, i32) {
    %c0_i32 = arith.constant 0 : i32
    %c0_i32_0 = arith.constant 0 : i32
    %c0_i32_1 = arith.constant 0 : i32
    return %arg0, %arg1, %c0_i32, %c0_i32_0 : i32, i32, i32, i32
  }
  func.func @transform_1(%arg0: i32, %arg1: i32, %arg2: i32) -> (i32, i32, i32) {
    %c0_i32 = arith.constant 0 : i32
    %c0_i32_0 = arith.constant 0 : i32
    %c0_i32_1 = arith.constant 0 : i32
    return %arg2, %c0_i32, %c0_i32_0 : i32, i32, i32
  }
  func.func @transform_2(%arg0: i32, %arg1: i32, %arg2: i32) -> (i32, i32, i32) {
    %c0_i32 = arith.constant 0 : i32
    %c0_i32_0 = arith.constant 0 : i32
    %c0_i32_1 = arith.constant 0 : i32
    return %arg2, %c0_i32, %c0_i32_0 : i32, i32, i32
  }
  func.func @transform_3(%arg0: i32, %arg1: i32, %arg2: i32) -> (i32, i32, i32) {
    %c0_i32 = arith.constant 0 : i32
    %c0_i32_0 = arith.constant 0 : i32
    %c0_i32_1 = arith.constant 0 : i32
    return %arg2, %c0_i32, %c0_i32_0 : i32, i32, i32
  }
  func.func @transform_4(%arg0: i32, %arg1: i32, %arg2: i32) -> (i32, i32, i32) {
    %c0_i32 = arith.constant 0 : i32
    return %arg0, %arg2, %arg1 : i32, i32, i32
  }
}

</mosaic_0001>

<bundles_post_ra>
// kernel: tpu_custom_call.1
= control target key start
LH: loop header
LB: loop body
LE: loop exit
PB: predicated region body
PF: predicated region fallthrough
CT: control target
= control target key end

     0   :  { %9 = vsyncpa [#allocation3], 0  ;;  %s1386_s0 = inlined_call_operand.hbm [shape: f32[2,1,4,288], index: 0, kind: input, shape index: {}]   ;;  %s1387_s1 = inlined_call_operand.vmem [shape: f32[1,8,4], index: 1, kind: input, shape index: {}]   ;;  %s1388_s2 = inlined_call_operand.vmem [shape: f32[1,8,9], index: 2, kind: input, shape index: {}]   ;;  %s1389_s3 = inlined_call_operand.vmem [shape: f32[1,8,1], index: 3, kind: input, shape index: {}]   ;;  %s1390_s4 = inlined_call_operand.hbm [shape: f32[2,8,256], index: 4, kind: output, shape index: {}]  }
   0x1   :  { %11 = vsyncpa [#allocation3 + $0x1], 0 }
   0x2   :  { %12 = vsyncpa [#allocation4], 0 }
   0x3   :  { %14 = vsyncpa [#allocation4 + $0x1], 0  ;;  %s1108_s15 = smov 0   ;;  %s1110_s16 = smov 0  }
   0x4   :  { %s1112_s17 = smov 0   ;;  %s1114_s18 = smov 0  }
   0x5   :  { %s1116_s19 = smov 0   ;;  %s1118_s20 = smov 0  }
   0x6 LB: > { %s841_s21 = sadd.s32 4294967295, %s1064_s20   ;;  %s842_s22 = sadd.s32 4294967294, %s1064_s20   ;;  %s1064_s20 = sphi %s1118_s20, %s20_s20   ;;  %s1060_s19 = sphi %s1116_s19, %s1407_s19   ;;  %s1056_s18 = sphi %s1114_s18, %s1406_s18   ;;  %s1052_s17 = sphi %s1112_s17, %s1405_s17   ;;  %s1048_s16 = sphi %s1110_s16, %s1404_s16   ;;  %s1044_s15 = sphi %s1108_s15, %s1403_s15  }
   0x7   : > { %s39_s23 = sadd.s32 1, %s1060_s19  ;;  %s48_s24 = sadd.s32 1, %s1052_s17 }
   0x8   : > { %p41_p0 = scmp.ge.s32.totalorder %s39_s23, 2  ;;  %p55_p1 = scmp.ne.s32.totalorder %s1052_s17, %s1048_s16 }
   0x9   : > { %p56_p2 = scmp.eq.s32.totalorder %s1064_s20, 0  ;;  %p61_p3 = scmp.ne.s32.totalorder %s1048_s16, %s1044_s15 }
   0xa   : > { %s1409_s23 = smov (%p41_p0, %s39_s23), 0  ;;  %p62_p5 = scmp.eq.s32.totalorder %s841_s21, 0 }
   0xb   : > { %p1149_p4 = por %p56_p2, %p55_p1  ;;  %s43_s26 = ssub.s32 %s1060_s19, %s1409_s23 }
   0xc   : > { %p167_p6 = scmp.eq.s32.totalorder %s841_s21, 1  ;;  %p46_p7 = scmp.eq.s32.totalorder %s43_s26, 0 }
   0xd   : > { %p1155_p8 = por %p62_p5, %p61_p3  ;;  %p173_p10 = scmp.eq.s32.totalorder %s842_s22, 1 }
   0xe   : > { %p1159_p9 = por %p167_p6, %p55_p1  ;;  %p847_p12 = scmp.ge.s32.totalorder %s1064_s20, 2 }
   0xf   : > { %s1164_s29 = scalar_select %p46_p7, %s1052_s17, %s48_s24  }
  0x10   : > { %p1166_p11 = por %p173_p10, %p61_p3  ;;  %p872_p13 = scmp.lt.s32.totalorder %s1064_s20, 2 }
  0x11   : > { %s214_s5 = sand.u32 1, %s1052_s17   ;;  %s858_s7 = smul.u32 12, %s1060_s19 }
  0x12   : > { %s857_s6 = smul.u32 12, %s214_s5  ;;  %p865_p0 = pnand %p872_p13, %p1149_p4 }
  0x13   : > { %p849_p2 = scmp.ge.s32.totalorder %s1064_s20, 1  ;;  %s225_s10 = scalar_lea.hbm %s1386_s0, %s858_s7 }
  0x14   : > { %s218_s11 = scalar_lea.vmem [#allocation2], %s857_s6  ;;  %s227_s13 = sshll.u32 %s225_s10, 4  ;;  %s228_s13 = int_to_ptr.hbm [resolvable:$true] %s227_s13 }
  0x15   : > { %s229_s12 = sshll.u32 %s218_s11, 4  ;;  %s215_s14 = scalar_lea.sflag [#allocation3], %s214_s5  ;;  %s230_s12 = int_to_ptr.vmem [resolvable:$true] %s229_s12 }
  0x16   : > { %867 = dma.hbm_to_vmem [thread:$0]  (!%p865_p0), %s228_s13, 192, %s230_s12, %s215_s14  }
  0x17   : > { %p234_p1 = scmp.lt.s32.totalorder %s1064_s20, 3 }
  0x19   : > { %p235_p3 = pnand %p849_p2, %p234_p1 }
  0x1a   : > { %s1182_s21 = sand.u32 (!%p235_p3), 1, %s1048_s16  }
  0x1b   : > { %238 = sbr.rel (%p235_p3) target bundleno = 582 (0x246), region = 36  ;;  %s241_s24 = scalar_lea.sflag (!%p235_p3), [#allocation3], %s1182_s21 }
  0x1c   : > { %s859_s22 = smul.u32 (!%p235_p3), 12, %s1182_s21 }
  0x1e   : > { %s1186_s25 = scalar_lea.vmem (!%p235_p3), [#allocation2], %s859_s22 }
  0x20   : > { %1035 = dma.done.wait (%p1155_p8), %s241_s24, 192  }
  0x21   : > { %1037 = vsyncadd (%p1155_p8), %s241_s24, 4294967104  ;;  %v1066_v0 = vmov 2   ;;  %v1067_v1 = vmov 1   ;;  %v1068_v2 = vmov 4   ;;  %v297_v3 = vld [vmem:[%s1387_s1] sm:$0xff]  ;;  %v1069_v5 = vmov 3  }
  0x22   : > { %941 = vset.pattern.permute.xlu1 %v1066_v0  ;;  %939 = vset.pattern.permute.xlu0 %v1067_v1  ;;  %v1198_v4 = vld [vmem:[%s1388_s2] sm:$0xff]  ;;  %v1070_v6 = vmov 0   ;;  %v1071_v8 = vmov 5   ;;  %v1072_v9 = vmov 8   ;;  %v1073_v10 = vmov 6   ;;  %s1074_s9 = smov 1  }
  0x23   : > { %943 = vset.pattern.permute.xlu2 %v1068_v2  ;;  %337 = vperm.xlu1 %941, %v297_v3   ;;  %v406_v7 = vld [vmem:[%s1389_s3] sm:$0xff]  ;;  %v296_v12 = vld [vmem:[%s1186_s25 + $0x8] sm:$0xf]  ;;  %s1075_s10 = smov 127   ;;  %s1076_s11 = smov 111   ;;  %vm429_vm0 = vcmask 7168  }
  0x24   : > { %318 = vperm.xlu0 %939, %v297_v3   ;;  %409 = vperm.xlu2 %943, %v1198_v4   ;;  %v295_v11 = vld [vmem:[%s1186_s25] sm:$0xff]  ;;  %v323_v17 = vperm.slane %v296_v12, 1  ;;  %v307_v21 = vperm.slane %v296_v12, 0  ;;  %v342_v23 = vperm.slane %v296_v12, 2  ;;  %v361_v26 = vperm.slane %v296_v12, 3  ;;  %s1078_s12 = smov 113  }
  0x25   : > { %v321_v15 = vperm.slane %v295_v11, 1  ;;  %v322_v16 = vperm.slane %v295_v11, 5  ;;  %v340_v18 = vperm.slane %v295_v11, 2  ;;  %v305_v19 = vperm.slane %v295_v11, 0  ;;  %s1079_s13 = smov 95   ;;  %s1080_s14 = smov 97  }
  0x26   : > { %v306_v20 = vperm.slane %v295_v11, 4  ;;  %v341_v22 = vperm.slane %v295_v11, 6  ;;  %v359_v24 = vperm.slane %v295_v11, 3  ;;  %v360_v25 = vperm.slane %v295_v11, 7  ;;  %s1081_s22 = smov 16   ;;  %s1082_s24 = smov 112  }
  0x27   : > { %v327_v27 = vperm.slane %v321_v15, 1  ;;  %v328_v28 = vperm.slane %v322_v16, 1  ;;  %v329_v29 = vperm.slane %v323_v17, 1  ;;  %v346_v30 = vperm.slane %v340_v18, 2  ;;  %s850_s25 = sshll.u32 %s1182_s21, 4  ;;  %s856_s26 = sshll.u32 %s1056_s18, 4 }
  0x28   : > { %v311_v31 = vperm.slane %v305_v19, 0  ;;  %v312_v32 = vperm.slane %v306_v20, 0  ;;  %v313_v33 = vperm.slane %v307_v21, 0  ;;  %v347_v34 = vperm.slane %v341_v22, 2  ;;  %s702_s7 = scalar_lea.hbm %s1390_s4, %s856_s26  ;;  %s281_s27 = scalar_lea.vmem [#allocation5], %s850_s25 }
  0x29   : > { %v348_v35 = vperm.slane %v342_v23, 2  ;;  %v365_v36 = vperm.slane %v359_v24, 3  ;;  %v366_v37 = vperm.slane %v360_v25, 3  ;;  %v367_v39 = vperm.slane %v361_v26, 3  ;;  %s704_s8 = sshll.u32 %s281_s27, 4  ;;  %s687_s18 = scalar_lea.sflag [#allocation4], %s1182_s21  ;;  %s705_s8 = int_to_ptr.vmem [resolvable:$true] %s704_s8 }
  0x2a   : > { %v374_v19 = vlaneseq  ;;  %vm445_vm1 = vcmask 1039360   ;;  %vm522_vm4 = vcmask 908288   ;;  %vm533_vm6 = vcmask 924672  }
  0x2b   : > { %942 = vset.pattern.permute.xlu1 %v1069_v5  ;;  %vm586_vm8 = vcmask 777216   ;;  %vm599_vm9 = vcmask 793600   ;;  %vm470_vm10 = vcmask 130048   ;;  %vm662_vm11 = vcmask 916480  }
  0x2c   : > { %940 = vset.pattern.permute.xlu0 %v1070_v6  ;;  %356 = vperm.xlu1 %942, %v297_v3   ;;  %v375_v22 = vand.u32 127, %v374_v19 }
  0x2d   : > { %300 = vperm.xlu0 %940, %v297_v3   ;;  %944 = vset.pattern.permute.xlu2 %v1070_v6 }
  0x2e   : > { %417 = vperm.xlu2 %944, %v406_v7   ;;  %v1077_v7 = vmov 7   ;;  %v376_v24 = vadd.s32 128, %v375_v22 }
  0x34   : > { %946 = vset.pattern.permute.xlu1 %v1067_v1 }
  0x35   : > { %459 = vperm.xlu0 %940, %v1198_v4   ;;  %498 = vperm.xlu1 %946, %v1198_v4  }
  0x36   : > { %945 = vset.pattern.permute.xlu2 %v1066_v0 }
  0x37   : > { %479 = vperm.xlu2 %945, %v1198_v4  }
  0x3d   : > { %949 = vset.pattern.permute.xlu1 %v1073_v10  ;;  %951 = vset.pattern.permute.xlu0 %v1077_v7 }
  0x3e   : > { %609 = vperm.xlu1 %949, %v1198_v4  }
  0x3f   : > { %947 = vset.pattern.permute.xlu2 %v1069_v5 }
  0x40   : > { %543 = vperm.xlu2 %947, %v1198_v4  }
  0x48   : > { %948 = vset.pattern.permute.xlu2 %v1071_v8 }
  0x49   : > { %562 = vperm.xlu2 %948, %v1198_v4  }
  0x51   : > { %950 = vset.pattern.permute.xlu2 %v1072_v9 }
  0x52   : > { %628 = vperm.xlu2 %950, %v1198_v4  }
  0x7e   : > { %v410_v38 = vpop.permute.xlu2 %409 }
  0x88   : > { %v418_v63 = vpop.permute.xlu2 %417 }
  0x91   : > { %v480_v11 = vpop.permute.xlu2 %479 }
  0x95   : > { %v338_v14 = vpop.permute.xlu1 %337 }
  0x96   : > { %v319_v13 = vpop.permute.xlu0 %318  ;;  %v349_v44 = vmul.f32 %v346_v30, %v338_v14  ;;  %v350_v49 = vmul.f32 %v347_v34, %v338_v14  ;;  %v351_v50 = vmul.f32 %v348_v35, %v338_v14  ;;  %v388_v30 = vand.u32 15, %v376_v24 }
  0x97   : > { %v330_v40 = vmul.f32 %v327_v27, %v319_v13  ;;  %v331_v41 = vmul.f32 %v328_v28, %v319_v13  ;;  %v332_v42 = vmul.f32 %v329_v29, %v319_v13 }
  0x98   : > { %vm1271_vm5 = vcmp.eq.s32.totalorder %v388_v30, 0  ;;  %vm1287_vm7 = vcmp.eq.s32.totalorder %v388_v30, 15 }
  0x9a   : > { %v544_v12 = vpop.permute.xlu2 %543 }
  0x9e   : > { %v357_v48 = vpop.permute.xlu1 %356 }
  0x9f   : > { %v301_v43 = vpop.permute.xlu0 %300  ;;  %v368_v51 = vmul.f32 %v365_v36, %v357_v48  ;;  %v369_v52 = vmul.f32 %v366_v37, %v357_v48  ;;  %v370_v56 = vmul.f32 %v367_v39, %v357_v48 }
  0xa0   : > { %v314_v45 = vmul.f32 %v311_v31, %v301_v43  ;;  %v315_v46 = vmul.f32 %v312_v32, %v301_v43  ;;  %v316_v47 = vmul.f32 %v313_v33, %v301_v43 }
  0xa2   : > { %v333_v53 = vadd.f32 %v330_v40, %v314_v45  ;;  %v334_v54 = vadd.f32 %v331_v41, %v315_v46  ;;  %v335_v55 = vadd.f32 %v332_v42, %v316_v47 }
  0xa3   : > { %v1250_v13 = vpop.permute.xlu2 %562 }
  0xa4   : > { %v352_v57 = vadd.f32 %v349_v44, %v333_v53  ;;  %v353_v58 = vadd.f32 %v350_v49, %v334_v54  ;;  %v354_v59 = vadd.f32 %v351_v50, %v335_v55 }
  0xa6   : > { %v1213_v60 = vadd.f32 %v368_v51, %v352_v57  ;;  %v1215_v61 = vadd.f32 %v369_v52, %v353_v58  ;;  %v1217_v62 = vadd.f32 %v370_v56, %v354_v59 }
  0xa7   : > { %v499_v8 = vpop.permute.xlu1 %498  ;;  %v460_v17 = vpop.permute.xlu0 %459 }
  0xa8   : > { %v412_v0 = vmul.f32 %v410_v38, %v1213_v60  ;;  %v413_v1 = vmul.f32 %v410_v38, %v1215_v61  ;;  %v414_v2 = vmul.f32 %v410_v38, %v1217_v62  ;;  %427 = vrot.lane.b32.xlu2 %v1215_v61, %s1074_s9  ;;  %439 = vrot.lane.b32.xlu0 %v1213_v60, %s1075_s10 }
  0xa9   : > { %425 = vrot.lane.b32.xlu1 %v1213_v60, %s1074_s9  ;;  %v501_v9 = vmul.f32 %v499_v8, %v1213_v60  ;;  %v502_v10 = vmul.f32 %v499_v8, %v1215_v61  ;;  %s706_s9 = sshll.u32 %s702_s7, 4  ;;  %s707_s9 = int_to_ptr.hbm [resolvable:$true] %s706_s9 }
  0xaa   : > { %v1225_v3 = vadd.f32 %v418_v63, %v412_v0  ;;  %v1227_v5 = vadd.f32 %v418_v63, %v413_v1  ;;  %v1229_v6 = vadd.f32 %v418_v63, %v414_v2 }
  0xac   : > { %v1252_v14 = vpop.permute.xlu2 %628 }
  0xb0   : > { %443 = vrot.lane.b32.xlu2 %v1217_v62, %s1075_s10  ;;  %518 = vrot.lane.b32.xlu0 %v1215_v61, %s1076_s11  ;;  %v1254_v16 = vpop.permute.xlu1 %609 }
  0xb1   : > { %441 = vrot.lane.b32.xlu1 %v1215_v61, %s1075_s10  ;;  %s996_s10 = sshra.s32 %s707_s9, 4  ;;  %s997_s10 = int_to_ptr.hbm [resolvable:$true] %s996_s10 }
  0xb2   : > { %p1003_p7 = scmp.lt.s32.totalorder %s997_s10, %s1390_s4 }
  0xb8   : > { %516 = vrot.lane.b32.xlu2 %v1213_v60, %s1076_s11  ;;  %529 = vrot.lane.b32.xlu0 %v1215_v61, %s1078_s12 }
  0xb9   : > { %520 = vrot.lane.b32.xlu1 %v1217_v62, %s1076_s11  ;;  %s998_s11 = scalar_lea.hbm %s997_s10, 16 }
  0xba   : > { %p999_p4 = scmp.ne.s32.totalorder %s997_s10, %s998_s11 }
  0xbc   : > { %p1000_p5 = pnand %p999_p4, %p1159_p9 }
  0xbe   : > { %p1001_p6 = pneg %p1000_p5 }
  0xc0   : > { %527 = vrot.lane.b32.xlu2 %v1213_v60, %s1078_s12  ;;  %582 = vrot.lane.b32.xlu0 %v1215_v61, %s1079_s13 }
  0xc1   : > { %531 = vrot.lane.b32.xlu1 %v1217_v62, %s1078_s12 }
  0xc8   : > { %595 = vrot.lane.b32.xlu2 %v1215_v61, %s1080_s14  ;;  %580 = vrot.lane.b32.xlu0 %v1213_v60, %s1079_s13 }
  0xc9   : > { %584 = vrot.lane.b32.xlu1 %v1217_v62, %s1079_s13 }
  0xd0   : > { %597 = vrot.lane.b32.xlu0 %v1217_v62, %s1080_s14  ;;  %505 = vrot.lane.b32.xlu2 %v501_v9, %s1081_s22 }
  0xd1   : > { %593 = vrot.lane.b32.xlu1 %v1213_v60, %s1080_s14  ;;  %s1002_s14 = scalar_lea.hbm %s1390_s4, 32 }
  0xd2   : > { %p1004_p8 = scmp.lt.s32.totalorder %s1002_s14, %s998_s11 }
  0xd4   : > { %p1005_p10 = por %p1004_p8, %p1003_p7 }
  0xd6   : > { %p1006_p13 = pnand %p1005_p10, %p1001_p6 }
  0xd8   : > { %647 = vperm.xlu0 %951, %v1198_v4   ;;  %v381_v4 = vand.u32 15, %v375_v22 }
  0xda   : > { %vm1256_vm2 = vcmp.eq.s32.totalorder %v381_v4, 0  ;;  %vm1260_vm3 = vcmp.eq.s32.totalorder %v381_v4, 15 }
  0xe0   : > { %507 = vrot.lane.b32.xlu0 %v502_v10, %s1081_s22 }
 0x102   : > { %v428_v15 = vpop.permute.xlu2 %427 }
 0x10a   : > { %v444_v18 = vpop.permute.xlu2 %443 }
 0x112   : > { %v517_v23 = vpop.permute.xlu2 %516 }
 0x11a   : > { %v440_v20 = vpop.permute.xlu0 %439  ;;  %v528_v38 = vpop.permute.xlu2 %527 }
 0x11b   : > { %v426_v21 = vpop.permute.xlu1 %425 }
 0x11c   : > { %v433_v29 = vsel %vm429_vm0, %v1213_v60, %v426_v21  ;;  %v430_v39 = vsel %vm429_vm0, %v426_v21, %v428_v15 }
 0x122   : > { %v519_v25 = vpop.permute.xlu0 %518  ;;  %v596_v1 = vpop.permute.xlu2 %595 }
 0x123   : > { %v442_v28 = vpop.permute.xlu1 %441  ;;  %v523_v41 = vsel %vm522_vm4, %v517_v23, %v519_v25 }
 0x124   : > { %v446_v31 = vsel %vm445_vm1, %v440_v20, %v442_v28  ;;  %v447_v37 = vsel %vm445_vm1, %v442_v28, %v444_v18 }
 0x125   : > { %v450_v32 = vsel %vm1256_vm2, %v446_v31, %v433_v29  ;;  %v456_v33 = vsel %vm1260_vm3, %v433_v29, %v446_v31  ;;  %v451_v42 = vsel %vm1271_vm5, %v447_v37, %v430_v39  ;;  %v457_v50 = vsel %vm1287_vm7, %v430_v39, %v447_v37 }
 0x126   : > { %v462_v34 = vmul.f32 %v460_v17, %v450_v32  ;;  %v482_v35 = vmul.f32 %v480_v11, %v456_v33  ;;  %v463_v47 = vmul.f32 %v460_v17, %v451_v42  ;;  %v483_v55 = vmul.f32 %v480_v11, %v457_v50 }
 0x128   : > { %466 = vrot.lane.b32.xlu1 %v462_v34, %s1081_s22  ;;  %486 = vrot.lane.b32.xlu2 %v482_v35, %s1081_s22 }
 0x12a   : > { %v530_v40 = vpop.permute.xlu0 %529 }
 0x12b   : > { %v534_v43 = vsel %vm533_vm6, %v528_v38, %v530_v40  ;;  %v521_v44 = vpop.permute.xlu1 %520 }
 0x12c   : > { %v540_v45 = vsel %vm1260_vm3, %v534_v43, %v523_v41  ;;  %v524_v52 = vsel %vm522_vm4, %v519_v25, %v521_v44  ;;  %v538_v58 = vsel %vm1256_vm2, %v523_v41, %v534_v43 }
 0x12d   : > { %v565_v46 = vmul.f32 %v1250_v13, %v540_v45  ;;  %v546_v63 = vmul.f32 %v544_v12, %v538_v58 }
 0x12f   : > { %569 = vrot.lane.b32.xlu0 %v565_v46, %s1081_s22 }
 0x130   : > { %468 = vrot.lane.b32.xlu1 %v463_v47, %s1081_s22 }
 0x132   : > { %v583_v49 = vpop.permute.xlu0 %582 }
 0x133   : > { %v532_v51 = vpop.permute.xlu1 %531 }
 0x134   : > { %v535_v53 = vsel %vm533_vm6, %v530_v40, %v532_v51 }
 0x135   : > { %v539_v54 = vsel %vm1271_vm5, %v524_v52, %v535_v53  ;;  %v541_v7 = vsel %vm1287_vm7, %v535_v53, %v524_v52 }
 0x136   : > { %v547_v56 = vmul.f32 %v544_v12, %v539_v54  ;;  %v566_v19 = vmul.f32 %v1250_v13, %v541_v7 }
 0x138   : > { %488 = vrot.lane.b32.xlu1 %v483_v55, %s1081_s22  ;;  %552 = vrot.lane.b32.xlu2 %v547_v56, %s1081_s22 }
 0x13a   : > { %v581_v57 = vpop.permute.xlu0 %580 }
 0x13b   : > { %v585_v59 = vpop.permute.xlu1 %584  ;;  %v587_v11 = vsel %vm586_vm8, %v581_v57, %v583_v49 }
 0x13c   : > { %v588_v0 = vsel %vm586_vm8, %v583_v49, %v585_v59 }
 0x13d   : > { %v592_v8 = vsel %vm445_vm1, %v588_v0, %v440_v20 }
 0x140   : > { %550 = vrot.lane.b32.xlu1 %v546_v63, %s1081_s22 }
 0x142   : > { %v598_v2 = vpop.permute.xlu0 %597 }
 0x143   : > { %v601_v9 = vsel %vm599_vm9, %v596_v1, %v598_v2  ;;  %v594_v10 = vpop.permute.xlu1 %593 }
 0x144   : > { %v605_v15 = vsel %vm1271_vm5, %v592_v8, %v601_v9  ;;  %v600_v17 = vsel %vm599_vm9, %v594_v10, %v596_v1  ;;  %v607_v22 = vsel %vm1287_vm7, %v601_v9, %v592_v8 }
 0x145   : > { %v604_v12 = vsel %vm1256_vm2, %v587_v11, %v600_v17  ;;  %v613_v18 = vmul.f32 %v1254_v16, %v605_v15  ;;  %v606_v4 = vsel %vm1260_vm3, %v600_v17, %v587_v11  ;;  %v632_v13 = vmul.f32 %v1252_v14, %v607_v22 }
 0x146   : > { %v612_v21 = vmul.f32 %v1254_v16, %v604_v12  ;;  %v631_v24 = vmul.f32 %v1252_v14, %v606_v4 }
 0x147   : > { %618 = vrot.lane.b32.xlu0 %v613_v18, %s1081_s22 }
 0x148   : > { %571 = vrot.lane.b32.xlu1 %v566_v19, %s1081_s22  ;;  %616 = vrot.lane.b32.xlu2 %v612_v21, %s1081_s22 }
 0x14a   : > { %v648_v20 = vpop.permute.xlu0 %647 }
 0x14b   : > { %v650_v23 = vmul.f32 %v648_v20, %v1213_v60  ;;  %v651_v16 = vmul.f32 %v648_v20, %v1215_v61  ;;  %v652_v25 = vmul.f32 %v648_v20, %v1217_v62  ;;  %v506_v60 = vpop.permute.xlu2 %505 }
 0x14f   : > { %656 = vrot.lane.b32.xlu0 %v650_v23, %s1082_s24 }
 0x150   : > { %635 = vrot.lane.b32.xlu1 %v631_v24, %s1081_s22  ;;  %637 = vrot.lane.b32.xlu2 %v632_v13, %s1081_s22 }
 0x152   : > { %v508_v30 = vpop.permute.xlu0 %507 }
 0x153   : > { %v509_v47 = vsel %vm470_vm10, %v506_v60, %v508_v30 }
 0x158   : > { %658 = vrot.lane.b32.xlu1 %v651_v16, %s1082_s24  ;;  %660 = vrot.lane.b32.xlu2 %v652_v25, %s1082_s24 }
 0x182   : > { %v487_v27 = vpop.permute.xlu2 %486 }
 0x192   : > { %v553_v14 = vpop.permute.xlu2 %552 }
 0x19a   : > { %v467_v26 = vpop.permute.xlu1 %466 }
 0x19b   : > { %v475_v62 = vadd.f32 %v467_v26, %v1225_v3 }
 0x19d   : > { %v494_v40 = vadd.f32 %v487_v27, %v475_v62 }
 0x19f   : > { %v513_v46 = vadd.f32 %v506_v60, %v494_v40 }
 0x1a1   : > { %v570_v35 = vpop.permute.xlu0 %569 }
 0x1a2   : > { %v469_v28 = vpop.permute.xlu1 %468  ;;  %v617_v31 = vpop.permute.xlu2 %616 }
 0x1a3   : > { %v477_v32 = vadd.f32 %v469_v28, %v1229_v6  ;;  %v471_v37 = vsel %vm470_vm10, %v467_v26, %v469_v28 }
 0x1a4   : > { %v476_v41 = vadd.f32 %v471_v37, %v1227_v5 }
 0x1aa   : > { %v489_v29 = vpop.permute.xlu1 %488  ;;  %v638_v36 = vpop.permute.xlu2 %637 }
 0x1ab   : > { %v496_v33 = vadd.f32 %v489_v29, %v477_v32  ;;  %v490_v38 = vsel %vm470_vm10, %v487_v27, %v489_v29 }
 0x1ac   : > { %v495_v44 = vadd.f32 %v490_v38, %v476_v41 }
 0x1ad   : > { %v515_v61 = vadd.f32 %v508_v30, %v496_v33 }
 0x1ae   : > { %v514_v49 = vadd.f32 %v509_v47, %v495_v44 }
 0x1af   : > { %v560_v39 = vadd.f32 %v553_v14, %v515_v61 }
 0x1b2   : > { %v551_v34 = vpop.permute.xlu1 %550  ;;  %v661_v51 = vpop.permute.xlu2 %660 }
 0x1b3   : > { %v554_v48 = vsel %vm470_vm10, %v551_v34, %v553_v14  ;;  %v558_v50 = vadd.f32 %v551_v34, %v513_v46 }
 0x1b4   : > { %v559_v54 = vadd.f32 %v554_v48, %v514_v49 }
 0x1b5   : > { %v577_v5 = vadd.f32 %v570_v35, %v558_v50 }
 0x1b7   : > { %v624_v59 = vadd.f32 %v617_v31, %v577_v5 }
 0x1b9   : > { %v619_v6 = vpop.permute.xlu0 %618 }
 0x1ba   : > { %v572_v42 = vpop.permute.xlu1 %571  ;;  %v620_v57 = vsel %vm470_vm10, %v617_v31, %v619_v6 }
 0x1bb   : > { %v579_v43 = vadd.f32 %v572_v42, %v560_v39  ;;  %v573_v52 = vsel %vm470_vm10, %v570_v35, %v572_v42 }
 0x1bc   : > { %v578_v56 = vadd.f32 %v573_v52, %v559_v54 }
 0x1bd   : > { %v626_v45 = vadd.f32 %v619_v6, %v579_v43 }
 0x1be   : > { %v625_v63 = vadd.f32 %v620_v57, %v578_v56 }
 0x1bf   : > { %v645_v3 = vadd.f32 %v638_v36, %v626_v45 }
 0x1c1   : > { %v670_v53 = vadd.f32 %v661_v51, %v645_v3  ;;  %v657_v0 = vpop.permute.xlu0 %656 }
 0x1c2   : > { %v636_v55 = vpop.permute.xlu1 %635 }
 0x1c3   : > { %678 = vrot.lane.b32.xlu2 %v670_v53, %s1082_s24  ;;  %v639_v58 = vsel %vm470_vm10, %v636_v55, %v638_v36  ;;  %v643_v1 = vadd.f32 %v636_v55, %v624_v59 }
 0x1c4   : > { %v644_v2 = vadd.f32 %v639_v58, %v625_v63 }
 0x1ca   : > { %v659_v7 = vpop.permute.xlu1 %658 }
 0x1cb   : > { %v663_v8 = vsel %vm662_vm11, %v657_v0, %v659_v7  ;;  %v664_v9 = vsel %vm662_vm11, %v659_v7, %v661_v51 }
 0x1cc   : > { %v668_v10 = vadd.f32 %v663_v8, %v643_v1  ;;  %v669_v11 = vadd.f32 %v664_v9, %v644_v2 }
 0x1ce   : > { %676 = vrot.lane.b32.xlu1 %v669_v11, %s1082_s24  ;;  %674 = vrot.lane.b32.xlu0 %v668_v10, %s1082_s24 }
 0x21d   : > { %v679_v15 = vpop.permute.xlu2 %678 }
 0x240   : > { %v677_v17 = vpop.permute.xlu1 %676  ;;  %v675_v12 = vpop.permute.xlu0 %674 }
 0x241   : > { %v681_v18 = vsel %vm662_vm11, %v677_v17, %v679_v15  ;;  %v680_v19 = vsel %vm662_vm11, %v675_v12, %v677_v17 }
 0x242   : > { %685 = vst [vmem:[%s281_s27 + $0x8] sm:$0xff] %v681_v18 }
 0x243   : > { %684 = vst [vmem:[%s281_s27] sm:$0xff] %v680_v19 }
 0x244   : > { %1009 = shalt.err (!%p1006_p13)
}
 0x245   : > { %862 = dma.vmem_to_hbm [thread:$0]  (%p1159_p9), %s705_s8, 256, %s707_s9, %s687_s18  }
 0x246 PF: > { %s718_s21 = sand.u32 1, %s1044_s15   ;;  %p869_p0 = pnand %p847_p12, %p1166_p11 }
 0x247   : > { %s719_s25 = scalar_lea.sflag [#allocation4], %s718_s21 }
 0x248   : > { %p870_p2 = pneg %p869_p0 }
 0x24a   : > { %1039 = dma.done.wait (%p870_p2), %s719_s25, 256  }
 0x24b   : > { %1041 = vsyncadd (%p870_p2), %s719_s25, 4294967040  ;;  %s20_s20 = sadd.s32 1, %s1064_s20   ;;  %s1403_s15 = smov %s1048_s16 }
 0x24c   : > { %p17_p1 = scmp.ge.s32.totalorder %s20_s20, 4   ;;  %s1404_s16 = smov %s1052_s17 }
 0x24d   : > { %s1405_s17 = smov %s1164_s29  ;;  %s1406_s18 = smov %s1060_s19 }
 0x24e   : > { %s1407_s19 = smov %s1409_s23  ;;  %19 = sbr.rel (!%p17_p1) target bundleno = 6 (0x6), region = 90 }
 0x253   :  { %725 = vsyncpa [#allocation3], 1 }
 0x254   :  { %727 = vsyncpa [#allocation3 + $0x1], 1 }
 0x255   :  { %728 = vsyncpa [#allocation4], 1 }
 0x256   :  { %730 = vsyncpa [#allocation4 + $0x1], 1 }

</bundles_post_ra>
